<compile_context>
chip_gen: v7x
topology: tpu7x:2x2x1
jax: 0.10.0
libtpu: 0.0.40
codegen_flags: <defaults>
</compile_context>

<pallas_src>
import jax
import jax.numpy as jnp
from jax.experimental import pallas as pl
from jax.experimental.pallas import tpu as pltpu


def _make_kernel(bb, A, D, add_self):
    AD = A * D

    def kernel(nf_ref, nf_flat_ref, adj_ref, w_ref, b_ref, out_ref):
        # nf_ref      : (bb, A, D)    node features for this batch block
        # nf_flat_ref : (bb, 1, A*D)  same HBM data, (agent, feature) flattened into lanes
        # adj_ref     : (bb, A, A)
        # w_ref       : (D, 2D) = [W1^T | W2^T]   (resident across grid steps)
        # b_ref       : (1, D)                    (resident across grid steps)
        # out_ref     : (1, bb, A*D)  lane-dense output slab
        nf = nf_ref[...]                       # (bb, A, D)
        adj = adj_ref[...]                     # (bb, A, A)

        if add_self:
            # add_self eye fold done in-kernel (no per-call (B,A,A) add in the wrapper)
            ii = jax.lax.broadcasted_iota(jnp.int32, (A, A), 0)
            jj = jax.lax.broadcasted_iota(jnp.int32, (A, A), 1)
            adj = adj + (ii == jj).astype(adj.dtype)[None, :, :]

        # --- one fused MXU matmul for the whole block: [p | q] = nf @ [W1^T | W2^T]
        y = jnp.dot(nf.reshape(bb * A, D), w_ref[...],
                    preferred_element_type=jnp.float32)            # (bb*A, 2D)
        p = (y[:, :D] + b_ref[...]).reshape(bb, A, D)   # j-half ("repeat"), bias folded in
        q = y[:, D:].reshape(bb, A, D)                  # i-half ("repeat_interleave")

        # --- lane-dense elementwise path: rows = i, lanes = (j, d) flattened to A*D.
        # p_flat[b, 0, j*D+d]  = p[b, j, d]
        p_flat = jnp.concatenate([p[:, j:j + 1, :] for j in range(A)], axis=-1)   # (bb, 1, A*D)
        # q_rep[b, i, j*D+d]   = q[b, i, d]
        q_rep = jnp.concatenate([q] * A, axis=-1)                                  # (bb, A, A*D)
        # adj_rep[b, i, j*D+d] = adj[b, i, j]
        adj_rep = jnp.concatenate(
            [jnp.broadcast_to(adj[:, :, j:j + 1], (bb, A, D)) for j in range(A)],
            axis=-1)                                                               # (bb, A, A*D)
        # nf_flat[b, 0, j*D+d] = nf[b, j, d]
        nf_flat = nf_flat_ref[...]                                                 # (bb, 1, A*D)

        # term[b, i, j*D+d] = sigmoid((p[b,j,d] + q[b,i,d]) * adj[b,i,j]) * nf[b,j,d]
        term = jax.nn.sigmoid((p_flat + q_rep) * adj_rep) * nf_flat                # (bb, A, A*D)

        # --- reduce over j via static lane-group slices: out[b, i, d] = sum_j term[b,i,j*D+d]
        out = term[:, :, 0:D]
        for j in range(1, A):
            out = out + term[:, :, j * D:(j + 1) * D]                              # (bb, A, D)

        # --- lane-dense store: out_flat[b, i*D+d] = out[b, i, d]
        out_flat = jnp.concatenate([out[:, i, :] for i in range(A)], axis=-1)      # (bb, A*D)
        out_ref[0] = out_flat.astype(out_ref.dtype)

    return kernel


def make_la_aggregator(weight, bias, *, add_self, agent_num):
    """Builds the forward fn. weight: (D, 2D) (PyTorch nn.Linear layout), bias: (D,).
    Parameter prep is hoisted here (once per parameter update, not per call)."""
    D = int(weight.shape[0])
    assert weight.shape[1] == 2 * D
    # y = [nf_j, nf_i] @ W.T + b  ==  nf_j @ W[:, :D].T  +  nf_i @ W[:, D:].T  + b
    w_cat = jnp.concatenate(
        [jnp.asarray(weight[:, :D], jnp.float32).T,
         jnp.asarray(weight[:, D:], jnp.float32).T], axis=1)          # (D, 2D) = [W1^T | W2^T]
    b2d = jnp.asarray(bias, jnp.float32).reshape(1, D)

    @jax.jit
    def forward(node_features, adj_list):
        B, A, D_ = node_features.shape
        assert A == agent_num and D_ == D
        AD = A * D

        # Batch-grid coarsening: bb batches per grid step (per-step overhead ~0.35us).
        # Keep >= 2 grid steps when possible (v7x has 2 TensorCores; harmless on
        # v5e/v6e), and cap per-step lane-dense intermediates at ~4 MiB of VMEM.
        max_bb = max(1, (4 << 20) // (4 * A * AD * 4))
        bb = min(max_bb, max(1, B // 2))
        while B % bb:
            bb -= 1
        G = B // bb

        # Free metadata reshape of the same HBM buffer (lane-flat view for the kernel).
        nf_flat = node_features.reshape(B, 1, AD)

        flops = B * (4 * A * D * D + 6 * A * A * D)
        bytes_accessed = 4 * (2 * B * A * D + B * A * A + 2 * D * D + D + B * A * D)
        cost = pl.CostEstimate(flops=flops, transcendentals=B * A * A * D,
                               bytes_accessed=bytes_accessed)

        out = pl.pallas_call(
            _make_kernel(bb, A, D, add_self),
            out_shape=jax.ShapeDtypeStruct((G, bb, AD), node_features.dtype),
            grid=(G,),
            in_specs=[
                pl.BlockSpec((bb, A, D), lambda g: (g, 0, 0)),     # node_features
                pl.BlockSpec((bb, 1, AD), lambda g: (g, 0, 0)),    # lane-flat view of nf
                pl.BlockSpec((bb, A, A), lambda g: (g, 0, 0)),     # adj_list
                pl.BlockSpec((D, 2 * D), lambda g: (0, 0)),        # [W1^T | W2^T] (resident)
                pl.BlockSpec((1, D), lambda g: (0, 0)),            # bias          (resident)
            ],
            out_specs=pl.BlockSpec((1, bb, AD), lambda g: (g, 0, 0)),
            compiler_params=pltpu.CompilerParams(
                dimension_semantics=("parallel",)),
            cost_estimate=cost,
        )(node_features, nf_flat, adj_list, w_cat, b2d)

        return out.reshape(B, A, D)

    return forward


def la_aggregator_ref(node_features, adj_list, weight, bias, *, add_self, agent_num):
    """Pure-JAX reference mirroring the PyTorch forward literally."""
    B, A, D = node_features.shape
    if add_self:
        adj_list = adj_list + jnp.eye(A, dtype=adj_list.dtype)[None, :, :]
    nf_repeat = jnp.tile(node_features, (1, agent_num, 1))                 # (B, A*A, D)
    nf_alter = jnp.repeat(node_features, agent_num, axis=1)                # (B, A*A, D)
    atten_input = jnp.concatenate([nf_repeat, nf_alter], axis=-1)
    atten_input = atten_input.reshape(-1, agent_num, agent_num, 2 * D)
    mask = atten_input @ weight.T + bias
    mask = mask * adj_list[..., None]
    mask = jax.nn.sigmoid(mask)
    return jnp.sum(mask * node_features[:, None, :, :], axis=-2)


if __name__ == "__main__":
    # Module config (small, consistent with forward).
    add_self = True
    sample_num = 4          # unused by forward (matches the PyTorch module)
    input_dim = 32
    agent_num = 8
    B = 2

    key = jax.random.PRNGKey(0)
    k_nf, k_adj, k_w, k_b = jax.random.split(key, 4)

    node_features = jax.random.normal(k_nf, (B, agent_num, input_dim), dtype=jnp.float32)
    adj_list = (jax.random.uniform(k_adj, (B, agent_num, agent_num)) > 0.5).astype(jnp.float32)

    # Deterministic Linear(input_dim*2 -> input_dim) parameters (PyTorch-style layout).
    bound = 1.0 / jnp.sqrt(2.0 * input_dim)
    weight = jax.random.uniform(k_w, (input_dim, 2 * input_dim),
                                minval=-bound, maxval=bound, dtype=jnp.float32)
    bias = jax.random.uniform(k_b, (input_dim,),
                              minval=-bound, maxval=bound, dtype=jnp.float32)

    la_forward = make_la_aggregator(weight, bias, add_self=add_self, agent_num=agent_num)
    out = jax.block_until_ready(la_forward(node_features, adj_list))

    ref = la_aggregator_ref(node_features, adj_list, weight, bias,
                            add_self=add_self, agent_num=agent_num)
    assert out.shape == (B, agent_num, input_dim)
    assert jnp.allclose(out, ref, atol=1e-5, rtol=1e-5), float(jnp.max(jnp.abs(out - ref)))

    print("KERNEL_OK")
</pallas_src>

<mosaic_0001>
module attributes {stable_mosaic.version = 11 : i64} {
  func.func @kernel(%arg0: i32, %arg1: memref<1x8x32xf32, #tpu.memory_space<vmem>>, %arg2: memref<1x1x256xf32, #tpu.memory_space<vmem>>, %arg3: memref<1x8x8xf32, #tpu.memory_space<vmem>>, %arg4: memref<32x64xf32, #tpu.memory_space<vmem>>, %arg5: memref<1x32xf32, #tpu.memory_space<vmem>>, %arg6: memref<1x1x256xf32, #tpu.memory_space<vmem>>) attributes {dimension_semantics = [#tpu.dimension_semantics<parallel>], iteration_bounds = array<i64: 2>, scalar_prefetch = 0 : i64, scratch_operands = 0 : i64, tpu.core_type = #tpu.core_type<tc>, window_params = [{transform_indices = @transform_0, window_bounds = array<i64: 1, 8, 32>}, {transform_indices = @transform_1, window_bounds = array<i64: 1, 1, 256>}, {transform_indices = @transform_2, window_bounds = array<i64: 1, 8, 8>}, {pipeline_mode = #tpu.pipeline_mode<synchronous>, transform_indices = @transform_3, window_bounds = array<i64: 32, 64>}, {pipeline_mode = #tpu.pipeline_mode<synchronous>, transform_indices = @transform_4, window_bounds = array<i64: 1, 32>}, {transform_indices = @transform_5, window_bounds = array<i64: 1, 1, 256>}]} {
    %c0 = arith.constant 0 : index
    %c0_0 = arith.constant 0 : index
    %c0_1 = arith.constant 0 : index
    %0 = vector.load %arg1[%c0, %c0_0, %c0_1] : memref<1x8x32xf32, #tpu.memory_space<vmem>>, vector<1x8x32xf32>
    %c0_2 = arith.constant 0 : index
    %c0_3 = arith.constant 0 : index
    %c0_4 = arith.constant 0 : index
    %1 = vector.load %arg3[%c0_2, %c0_3, %c0_4] : memref<1x8x8xf32, #tpu.memory_space<vmem>>, vector<1x8x8xf32>
    %2 = tpu.iota {dimensions = array<i32: 0>} : vector<8x8xi32>
    %3 = tpu.iota {dimensions = array<i32: 1>} : vector<8x8xi32>
    %4 = arith.cmpi eq, %2, %3 : vector<8x8xi32>
    %5 = arith.extui %4 : vector<8x8xi1> to vector<8x8xi32>
    %6 = arith.sitofp %5 : vector<8x8xi32> to vector<8x8xf32>
    %7 = vector.shape_cast %6 : vector<8x8xf32> to vector<1x8x8xf32>
    %8 = arith.addf %1, %7 : vector<1x8x8xf32>
    %9 = vector.shape_cast %0 : vector<1x8x32xf32> to vector<8x32xf32>
    %c0_5 = arith.constant 0 : index
    %c0_6 = arith.constant 0 : index
    %10 = vector.load %arg4[%c0_5, %c0_6] : memref<32x64xf32, #tpu.memory_space<vmem>>, vector<32x64xf32>
    %cst = arith.constant dense<0.000000e+00> : vector<8x64xf32>
    %11 = tpu.matmul %9, %10, %cst {dimension_numbers = #tpu.dot_dimension_numbers<[1], [0], [0], [1], [0, 0, 1, 1], [], []>} : vector<8x32xf32>, vector<32x64xf32>, vector<8x64xf32> -> vector<8x64xf32>
    %12 = vector.extract_strided_slice %11 {offsets = [0, 0], sizes = [8, 32], strides = [1, 1]} : vector<8x64xf32> to vector<8x32xf32>
    %c0_7 = arith.constant 0 : index
    %c0_8 = arith.constant 0 : index
    %13 = vector.load %arg5[%c0_7, %c0_8] : memref<1x32xf32, #tpu.memory_space<vmem>>, vector<1x32xf32>
    %14 = vector.broadcast %13 : vector<1x32xf32> to vector<8x32xf32>
    %15 = arith.addf %12, %14 : vector<8x32xf32>
    %16 = vector.shape_cast %15 : vector<8x32xf32> to vector<1x8x32xf32>
    %17 = vector.extract_strided_slice %11 {offsets = [0, 32], sizes = [8, 32], strides = [1, 1]} : vector<8x64xf32> to vector<8x32xf32>
    %18 = vector.shape_cast %17 : vector<8x32xf32> to vector<1x8x32xf32>
    %19 = vector.extract_strided_slice %16 {offsets = [0, 0, 0], sizes = [1, 1, 32], strides = [1, 1, 1]} : vector<1x8x32xf32> to vector<1x1x32xf32>
    %20 = vector.extract_strided_slice %16 {offsets = [0, 1, 0], sizes = [1, 1, 32], strides = [1, 1, 1]} : vector<1x8x32xf32> to vector<1x1x32xf32>
    %21 = vector.extract_strided_slice %16 {offsets = [0, 2, 0], sizes = [1, 1, 32], strides = [1, 1, 1]} : vector<1x8x32xf32> to vector<1x1x32xf32>
    %22 = vector.extract_strided_slice %16 {offsets = [0, 3, 0], sizes = [1, 1, 32], strides = [1, 1, 1]} : vector<1x8x32xf32> to vector<1x1x32xf32>
    %23 = vector.extract_strided_slice %16 {offsets = [0, 4, 0], sizes = [1, 1, 32], strides = [1, 1, 1]} : vector<1x8x32xf32> to vector<1x1x32xf32>
    %24 = vector.extract_strided_slice %16 {offsets = [0, 5, 0], sizes = [1, 1, 32], strides = [1, 1, 1]} : vector<1x8x32xf32> to vector<1x1x32xf32>
    %25 = vector.extract_strided_slice %16 {offsets = [0, 6, 0], sizes = [1, 1, 32], strides = [1, 1, 1]} : vector<1x8x32xf32> to vector<1x1x32xf32>
    %26 = vector.extract_strided_slice %16 {offsets = [0, 7, 0], sizes = [1, 1, 32], strides = [1, 1, 1]} : vector<1x8x32xf32> to vector<1x1x32xf32>
    %27 = tpu.concatenate %19, %20, %21, %22, %23, %24, %25, %26 in 2 : vector<1x1x32xf32>, vector<1x1x32xf32>, vector<1x1x32xf32>, vector<1x1x32xf32>, vector<1x1x32xf32>, vector<1x1x32xf32>, vector<1x1x32xf32>, vector<1x1x32xf32> -> vector<1x1x256xf32>
    %28 = tpu.concatenate %18, %18, %18, %18, %18, %18, %18, %18 in 2 : vector<1x8x32xf32>, vector<1x8x32xf32>, vector<1x8x32xf32>, vector<1x8x32xf32>, vector<1x8x32xf32>, vector<1x8x32xf32>, vector<1x8x32xf32>, vector<1x8x32xf32> -> vector<1x8x256xf32>
    %29 = vector.extract_strided_slice %8 {offsets = [0, 0, 0], sizes = [1, 8, 1], strides = [1, 1, 1]} : vector<1x8x8xf32> to vector<1x8x1xf32>
    %30 = vector.shape_cast %29 : vector<1x8x1xf32> to vector<1x8x1xf32>
    %31 = vector.broadcast %30 : vector<1x8x1xf32> to vector<1x8x32xf32>
    %32 = vector.extract_strided_slice %8 {offsets = [0, 0, 1], sizes = [1, 8, 1], strides = [1, 1, 1]} : vector<1x8x8xf32> to vector<1x8x1xf32>
    %33 = vector.shape_cast %32 : vector<1x8x1xf32> to vector<1x8x1xf32>
    %34 = vector.broadcast %33 : vector<1x8x1xf32> to vector<1x8x32xf32>
    %35 = vector.extract_strided_slice %8 {offsets = [0, 0, 2], sizes = [1, 8, 1], strides = [1, 1, 1]} : vector<1x8x8xf32> to vector<1x8x1xf32>
    %36 = vector.shape_cast %35 : vector<1x8x1xf32> to vector<1x8x1xf32>
    %37 = vector.broadcast %36 : vector<1x8x1xf32> to vector<1x8x32xf32>
    %38 = vector.extract_strided_slice %8 {offsets = [0, 0, 3], sizes = [1, 8, 1], strides = [1, 1, 1]} : vector<1x8x8xf32> to vector<1x8x1xf32>
    %39 = vector.shape_cast %38 : vector<1x8x1xf32> to vector<1x8x1xf32>
    %40 = vector.broadcast %39 : vector<1x8x1xf32> to vector<1x8x32xf32>
    %41 = vector.extract_strided_slice %8 {offsets = [0, 0, 4], sizes = [1, 8, 1], strides = [1, 1, 1]} : vector<1x8x8xf32> to vector<1x8x1xf32>
    %42 = vector.shape_cast %41 : vector<1x8x1xf32> to vector<1x8x1xf32>
    %43 = vector.broadcast %42 : vector<1x8x1xf32> to vector<1x8x32xf32>
    %44 = vector.extract_strided_slice %8 {offsets = [0, 0, 5], sizes = [1, 8, 1], strides = [1, 1, 1]} : vector<1x8x8xf32> to vector<1x8x1xf32>
    %45 = vector.shape_cast %44 : vector<1x8x1xf32> to vector<1x8x1xf32>
    %46 = vector.broadcast %45 : vector<1x8x1xf32> to vector<1x8x32xf32>
    %47 = vector.extract_strided_slice %8 {offsets = [0, 0, 6], sizes = [1, 8, 1], strides = [1, 1, 1]} : vector<1x8x8xf32> to vector<1x8x1xf32>
    %48 = vector.shape_cast %47 : vector<1x8x1xf32> to vector<1x8x1xf32>
    %49 = vector.broadcast %48 : vector<1x8x1xf32> to vector<1x8x32xf32>
    %50 = vector.extract_strided_slice %8 {offsets = [0, 0, 7], sizes = [1, 8, 1], strides = [1, 1, 1]} : vector<1x8x8xf32> to vector<1x8x1xf32>
    %51 = vector.shape_cast %50 : vector<1x8x1xf32> to vector<1x8x1xf32>
    %52 = vector.broadcast %51 : vector<1x8x1xf32> to vector<1x8x32xf32>
    %53 = tpu.concatenate %31, %34, %37, %40, %43, %46, %49, %52 in 2 : vector<1x8x32xf32>, vector<1x8x32xf32>, vector<1x8x32xf32>, vector<1x8x32xf32>, vector<1x8x32xf32>, vector<1x8x32xf32>, vector<1x8x32xf32>, vector<1x8x32xf32> -> vector<1x8x256xf32>
    %c0_9 = arith.constant 0 : index
    %c0_10 = arith.constant 0 : index
    %c0_11 = arith.constant 0 : index
    %54 = vector.load %arg2[%c0_9, %c0_10, %c0_11] : memref<1x1x256xf32, #tpu.memory_space<vmem>>, vector<1x1x256xf32>
    %55 = vector.broadcast %27 : vector<1x1x256xf32> to vector<1x8x256xf32>
    %56 = arith.addf %55, %28 : vector<1x8x256xf32>
    %57 = arith.mulf %56, %53 : vector<1x8x256xf32>
    %58 = arith.negf %57 : vector<1x8x256xf32>
    %59 = math.exp %58 : vector<1x8x256xf32>
    %cst_12 = arith.constant 1.000000e+00 : f32
    %60 = vector.broadcast %cst_12 : f32 to vector<1x8x256xf32>
    %61 = arith.addf %60, %59 : vector<1x8x256xf32>
    %62 = arith.divf %60, %61 : vector<1x8x256xf32>
    %63 = vector.broadcast %54 : vector<1x1x256xf32> to vector<1x8x256xf32>
    %64 = arith.mulf %62, %63 : vector<1x8x256xf32>
    %65 = vector.extract_strided_slice %64 {offsets = [0, 0, 0], sizes = [1, 8, 32], strides = [1, 1, 1]} : vector<1x8x256xf32> to vector<1x8x32xf32>
    %66 = vector.extract_strided_slice %64 {offsets = [0, 0, 32], sizes = [1, 8, 32], strides = [1, 1, 1]} : vector<1x8x256xf32> to vector<1x8x32xf32>
    %67 = arith.addf %65, %66 : vector<1x8x32xf32>
    %68 = vector.extract_strided_slice %64 {offsets = [0, 0, 64], sizes = [1, 8, 32], strides = [1, 1, 1]} : vector<1x8x256xf32> to vector<1x8x32xf32>
    %69 = arith.addf %67, %68 : vector<1x8x32xf32>
    %70 = vector.extract_strided_slice %64 {offsets = [0, 0, 96], sizes = [1, 8, 32], strides = [1, 1, 1]} : vector<1x8x256xf32> to vector<1x8x32xf32>
    %71 = arith.addf %69, %70 : vector<1x8x32xf32>
    %72 = vector.extract_strided_slice %64 {offsets = [0, 0, 128], sizes = [1, 8, 32], strides = [1, 1, 1]} : vector<1x8x256xf32> to vector<1x8x32xf32>
    %73 = arith.addf %71, %72 : vector<1x8x32xf32>
    %74 = vector.extract_strided_slice %64 {offsets = [0, 0, 160], sizes = [1, 8, 32], strides = [1, 1, 1]} : vector<1x8x256xf32> to vector<1x8x32xf32>
    %75 = arith.addf %73, %74 : vector<1x8x32xf32>
    %76 = vector.extract_strided_slice %64 {offsets = [0, 0, 192], sizes = [1, 8, 32], strides = [1, 1, 1]} : vector<1x8x256xf32> to vector<1x8x32xf32>
    %77 = arith.addf %75, %76 : vector<1x8x32xf32>
    %78 = vector.extract_strided_slice %64 {offsets = [0, 0, 224], sizes = [1, 8, 32], strides = [1, 1, 1]} : vector<1x8x256xf32> to vector<1x8x32xf32>
    %79 = arith.addf %77, %78 : vector<1x8x32xf32>
    %80 = vector.extract_strided_slice %79 {offsets = [0, 0, 0], sizes = [1, 1, 32], strides = [1, 1, 1]} : vector<1x8x32xf32> to vector<1x1x32xf32>
    %81 = vector.shape_cast %80 : vector<1x1x32xf32> to vector<1x32xf32>
    %82 = vector.extract_strided_slice %79 {offsets = [0, 1, 0], sizes = [1, 1, 32], strides = [1, 1, 1]} : vector<1x8x32xf32> to vector<1x1x32xf32>
    %83 = vector.shape_cast %82 : vector<1x1x32xf32> to vector<1x32xf32>
    %84 = vector.extract_strided_slice %79 {offsets = [0, 2, 0], sizes = [1, 1, 32], strides = [1, 1, 1]} : vector<1x8x32xf32> to vector<1x1x32xf32>
    %85 = vector.shape_cast %84 : vector<1x1x32xf32> to vector<1x32xf32>
    %86 = vector.extract_strided_slice %79 {offsets = [0, 3, 0], sizes = [1, 1, 32], strides = [1, 1, 1]} : vector<1x8x32xf32> to vector<1x1x32xf32>
    %87 = vector.shape_cast %86 : vector<1x1x32xf32> to vector<1x32xf32>
    %88 = vector.extract_strided_slice %79 {offsets = [0, 4, 0], sizes = [1, 1, 32], strides = [1, 1, 1]} : vector<1x8x32xf32> to vector<1x1x32xf32>
    %89 = vector.shape_cast %88 : vector<1x1x32xf32> to vector<1x32xf32>
    %90 = vector.extract_strided_slice %79 {offsets = [0, 5, 0], sizes = [1, 1, 32], strides = [1, 1, 1]} : vector<1x8x32xf32> to vector<1x1x32xf32>
    %91 = vector.shape_cast %90 : vector<1x1x32xf32> to vector<1x32xf32>
    %92 = vector.extract_strided_slice %79 {offsets = [0, 6, 0], sizes = [1, 1, 32], strides = [1, 1, 1]} : vector<1x8x32xf32> to vector<1x1x32xf32>
    %93 = vector.shape_cast %92 : vector<1x1x32xf32> to vector<1x32xf32>
    %94 = vector.extract_strided_slice %79 {offsets = [0, 7, 0], sizes = [1, 1, 32], strides = [1, 1, 1]} : vector<1x8x32xf32> to vector<1x1x32xf32>
    %95 = vector.shape_cast %94 : vector<1x1x32xf32> to vector<1x32xf32>
    %96 = tpu.concatenate %81, %83, %85, %87, %89, %91, %93, %95 in 1 : vector<1x32xf32>, vector<1x32xf32>, vector<1x32xf32>, vector<1x32xf32>, vector<1x32xf32>, vector<1x32xf32>, vector<1x32xf32>, vector<1x32xf32> -> vector<1x256xf32>
    %c0_13 = arith.constant 0 : index
    %c0_14 = arith.constant 0 : index
    %c0_15 = arith.constant 0 : index
    %97 = vector.load %arg6[%c0_13, %c0_14, %c0_15] : memref<1x1x256xf32, #tpu.memory_space<vmem>>, vector<1x1x256xf32>
    %98 = vector.shape_cast %97 : vector<1x1x256xf32> to vector<1x256xf32>
    %99 = vector.shape_cast %96 : vector<1x256xf32> to vector<1x1x256xf32>
    tpu.vector_store %arg6[%c0_13, %c0_14, %c0_15], %99 {strides = array<i32>} : memref<1x1x256xf32, #tpu.memory_space<vmem>>, vector<1x1x256xf32>,
    return
  }
  func.func @transform_0(%arg0: i32) -> (i32, i32, i32) {
    %c0_i32 = arith.constant 0 : i32
    %c0_i32_0 = arith.constant 0 : i32
    %c0_i32_1 = arith.constant 0 : i32
    return %arg0, %c0_i32, %c0_i32_0 : i32, i32, i32
  }
  func.func @transform_1(%arg0: i32) -> (i32, i32, i32) {
    %c0_i32 = arith.constant 0 : i32
    %c0_i32_0 = arith.constant 0 : i32
    %c0_i32_1 = arith.constant 0 : i32
    return %arg0, %c0_i32, %c0_i32_0 : i32, i32, i32
  }
  func.func @transform_2(%arg0: i32) -> (i32, i32, i32) {
    %c0_i32 = arith.constant 0 : i32
    %c0_i32_0 = arith.constant 0 : i32
    %c0_i32_1 = arith.constant 0 : i32
    return %arg0, %c0_i32, %c0_i32_0 : i32, i32, i32
  }
  func.func @transform_3(%arg0: i32) -> (i32, i32) {
    %c0_i32 = arith.constant 0 : i32
    %c0_i32_0 = arith.constant 0 : i32
    %c0_i32_1 = arith.constant 0 : i32
    return %c0_i32, %c0_i32_0 : i32, i32
  }
  func.func @transform_4(%arg0: i32) -> (i32, i32) {
    %c0_i32 = arith.constant 0 : i32
    %c0_i32_0 = arith.constant 0 : i32
    %c0_i32_1 = arith.constant 0 : i32
    return %c0_i32, %c0_i32_0 : i32, i32
  }
  func.func @transform_5(%arg0: i32) -> (i32, i32, i32) {
    %c0_i32 = arith.constant 0 : i32
    %c0_i32_0 = arith.constant 0 : i32
    %c0_i32_1 = arith.constant 0 : i32
    return %arg0, %c0_i32, %c0_i32_0 : i32, i32, i32
  }
}

</mosaic_0001>

<bundles_post_ra>
// kernel: forward.1
= control target key start
LH: loop header
LB: loop body
LE: loop exit
PB: predicated region body
PF: predicated region fallthrough
CT: control target
= control target key end

     0   :  { %10 = vsyncpa [#allocation3], 0  ;;  %s1172_s0 = inlined_call_operand.vmem [shape: f32[2,8,32], index: 0, kind: input, shape index: {}]   ;;  %s1173_s1 = inlined_call_operand.vmem [shape: f32[2,1,256], index: 1, kind: input, shape index: {}]   ;;  %s1174_s2 = inlined_call_operand.hbm [shape: f32[2,8,8], index: 2, kind: input, shape index: {}]   ;;  %s1175_s3 = inlined_call_operand.hbm [shape: f32[32,64], index: 3, kind: input, shape index: {}]   ;;  %s1176_s4 = inlined_call_operand.vmem [shape: f32[1,32], index: 4, kind: input, shape index: {}]   ;;  %s1177_s5 = inlined_call_operand.vmem [shape: f32[2,1,256], index: 5, kind: output, shape index: {}]  }
   0x1   :  { %12 = vsyncpa [#allocation3 + $0x1], 0 }
   0x2   :  { %13 = vsyncpa [#allocation5], 0  ;;  %s964_s18 = smov 0   ;;  %s966_s19 = smov 0  }
   0x3   :  { %s968_s20 = smov 0   ;;  %s970_s21 = smov 0  }
   0x4 LB: > { %s983_s22 = sadd.s32 4294967295, %s913_s21   ;;  %p91_p0 = scmp.ne.s32.totalorder %s905_s19, %s901_s18  ;;  %s913_s21 = sphi %s970_s21, %s1193_s21   ;;  %s909_s20 = sphi %s968_s20, %s1192_s20   ;;  %s905_s19 = sphi %s966_s19, %s1191_s19   ;;  %s901_s18 = sphi %s964_s18, %s1190_s18  }
   0x5   : > { %p1178_p1 = scmp.eq.s32.totalorder %s983_s22, 0  ;;  %p693_p2 = scmp.ge.s32.totalorder %s913_s21, 1 }
   0x6   : > { %p170_p3 = scmp.lt.s32.totalorder %s913_s21, 3  ;;  %s915_s25 = smov [#allocation4]  }
   0x7   : > { %p991_p4 = por %p1178_p1, %p91_p0  ;;  %s182_s26 = sshll.u32 %s915_s25, 4  ;;  %s183_s26 = int_to_ptr.vmem [resolvable:$true] %s182_s26 }
   0x8   : > { %p995_p5 = pnand %p693_p2, %p170_p3  ;;  %s1008_s28 = sadd.s32 1, %s913_s21  }
   0x9   : > { %s1181_s23 = scalar_select %p991_p4, 1, 0 }
   0xa   : > { %s1182_s24 = scalar_select %p995_p5, 1, 0 }
   0xb   : > { %p739_p6 = pneg %p995_p5  ;;  %s78_s29 = sadd.s32 1, %s909_s20 }
   0xc   : > { %s75_s30 = ssub.s32 %s913_s21, %s1008_s28  ;;  %s817_s8 = scalar_lea.hbm %s1175_s3, 512 }
   0xd   : > { %p1003_p7 = pnand %p739_p6, %p1178_p1  ;;  %p818_p8 = scmp.ne.s32.totalorder %s1175_s3, %s817_s8 }
   0xe   : > { %p824_p12 = scmp.lt.u32.totalorder %s817_s8, %s1175_s3 }
   0xf   : > { %p819_p9 = pneg %p1003_p7 }
  0x11   : > { %p820_p10 = pnand %p819_p9, %p818_p8 }
  0x13   : > { %p821_p11 = pneg %p820_p10 }
  0x15   : > { %p826_p13 = pnand %p824_p12, %p821_p11 }
  0x17   : > { %829 = shalt.err (!%p826_p13)
}
  0x18   : > { %s830_s13 = scalar_lea.vmem %s183_s26, 512  ;;  %p838_p6 = scmp.lt.s32.totalorder %s183_s26, %s183_s26 }
  0x19   : > { %p831_p0 = scmp.ne.s32.totalorder %s183_s26, %s830_s13  ;;  %p839_p1 = scmp.lt.s32.totalorder %s830_s13, %s830_s13 }
  0x1b   : > { %p833_p2 = pnand %p831_p0, %p819_p9  ;;  %p840_p4 = por %p839_p1, %p838_p6 }
  0x1d   : > { %p834_p3 = pneg %p833_p2 }
  0x1f   : > { %p841_p5 = pnand %p840_p4, %p834_p3 }
  0x21   : > { %844 = shalt.err (!%p841_p5)
}
  0x22   : > { %s916_s14 = smov 128   ;;  %s917_s15 = smov 8  }
  0x23   : > { %742 = dma.hbm_to_vmem [thread:$0]  (!%p1003_p7), %s1175_s3, 512, %s183_s26, [#allocation5], %s916_s14, %s916_s14, %s917_s15  }
  0x24   : > { %p76_p8 = scmp.eq.s32.totalorder %s75_s30, 0  ;;  %p85_p9 = scmp.ne.s32.totalorder %s909_s20, %s905_s19 }
  0x25   : > { %p86_p1 = scmp.eq.s32.totalorder %s913_s21, 0  ;;  %p748_p4 = scmp.lt.s32.totalorder %s913_s21, 2 }
  0x26   : > { %s1034_s18 = scalar_select %p76_p8, %s909_s20, %s78_s29  }
  0x27   : > { %p87_p5 = por %p86_p1, %p85_p9  ;;  %s213_s25 = sand.u32 1, %s909_s20  }
  0x28   : > { %s696_s6 = sshll.u32 %s213_s25, 3  ;;  %s697_s7 = sshll.u32 %s913_s21, 7 }
  0x29   : > { %s1041_s10 = scalar_lea.hbm %s1174_s2, %s697_s7  ;;  %s217_s26 = scalar_lea.vmem [#allocation2], %s696_s6 }
  0x2a   : > { %s224_s27 = sshll.u32 %s217_s26, 4  ;;  %p1045_p7 = pnand %p748_p4, %p87_p5  ;;  %s1043_s27 = int_to_ptr.vmem [resolvable:$true] %s224_s27 }
  0x2b   : > { %s214_s21 = scalar_lea.sflag [#allocation3], %s213_s25  ;;  %s845_s30 = scalar_lea.hbm %s1041_s10, 128 }
  0x2c   : > { %p846_p10 = scmp.ne.s32.totalorder %s1041_s10, %s845_s30  ;;  %p847_p11 = pneg %p1045_p7 }
  0x2d   : > { %s850_s13 = scalar_lea.hbm %s1174_s2, 256  ;;  %p851_p0 = scmp.lt.u32.totalorder %s1041_s10, %s1174_s2 }
  0x2e   : > { %p848_p12 = pnand %p847_p11, %p846_p10  ;;  %p852_p2 = scmp.lt.u32.totalorder %s850_s13, %s845_s30 }
  0x2f   : > { %p854_p6 = scmp.lt.u32.totalorder %s845_s30, %s1041_s10 }
  0x30   : > { %p849_p13 = pneg %p848_p12  ;;  %p853_p3 = por %p852_p2, %p851_p0 }
  0x32   : > { %p855_p8 = por %p854_p6, %p853_p3 }
  0x34   : > { %p856_p9 = pnand %p855_p8, %p849_p13 }
  0x36   : > { %859 = shalt.err (!%p856_p9)
}
  0x37   : > { %s860_s16 = scalar_lea.vmem %s1043_s27, 128  ;;  %s918_s17 = smov [#allocation2]  }
  0x38   : > { %p861_p1 = scmp.ne.s32.totalorder %s1043_s27, %s860_s16  ;;  %s865_s25 = sshll.u32 %s918_s17, 4  ;;  %s866_s25 = int_to_ptr.vmem [resolvable:$false] %s865_s25 }
  0x39   : > { %s867_s6 = scalar_lea.vmem %s866_s25, 256  ;;  %p868_p10 = scmp.lt.s32.totalorder %s1043_s27, %s866_s25 }
  0x3a   : > { %p863_p4 = pnand %p861_p1, %p847_p11  ;;  %p869_p12 = scmp.lt.s32.totalorder %s867_s6, %s860_s16 }
  0x3c   : > { %p864_p5 = pneg %p863_p4  ;;  %p870_p0 = por %p869_p12, %p868_p10 }
  0x3e   : > { %p871_p2 = pnand %p870_p0, %p864_p5 }
  0x40   : > { %874 = shalt.err (!%p871_p2)
}
  0x41   : > { %746 = dma.hbm_to_vmem [thread:$0]  (!%p1045_p7), %s1041_s10, 128, %s1043_s27, %s214_s21  }
  0x42   : > { %p1185_p13 = scmp.ne.s32.totalorder %s1182_s24, 0 }
  0x43   : > { %s235_s7 = sand.u32 (!%p1185_p13), 1, %s905_s19   ;;  %p1186_p11 = scmp.ne.s32.totalorder (!%p1185_p13), %s1181_s23, 0 }
  0x44   : > { %233 = sbr.rel (%p1185_p13) target bundleno = 739 (0x2e3), region = 40  ;;  %s699_s8 = sshll.u32 (!%p1185_p13), %s235_s7, 3 }
  0x45   : > { %s236_s9 = scalar_lea.sflag (!%p1185_p13), [#allocation3], %s235_s7  ;;  %s239_s26 = scalar_lea.vmem (!%p1185_p13), [#allocation2], %s699_s8 }
  0x4b   : > { %892 = dma.done.wait (%p1186_p11), %s236_s9, 128  }
  0x4c   : > { %894 = vsyncadd (%p1186_p11), %s236_s9, 4294967168  ;;  %p1187_p3 = scmp.eq.s32.totalorder %s983_s22, 0 }
  0x4e   : > { %896 = dma.done.wait (%p1187_p3), [#allocation5], 512   ;;  %p1188_p6 = pmov %p1187_p3 }
  0x4f   : > { %v291_v0 = vlaneseq  ;;  %p277_p7 = scmp.lt.s32.totalorder %s983_s22, 1  ;;  %v919_v1 = vmov 0.0|0.0   ;;  %vm920_vm0 = vmmov 0   ;;  %v921_v2 = vmov 0.0   ;;  %v299_v8 = vld [vmem:[#allocation4] sm:$0xff]  ;;  %v300_v9 = vld [vmem:[#allocation4 + $0x8] sm:$0xff] }
  0x50   : > { %898 = vsyncadd (%p1188_p6), [#allocation5], 4294966784  ;;  %727 = vmatprep.subr.bf16.mxu0 %v919_v1  ;;  %724 = vmatprep.mubr.msk.f32.mxu0 %vm920_vm0, %v921_v2  ;;  %v922_v5 = vmov 2   ;;  %v923_v6 = vmov 0   ;;  %v301_v10 = vld [vmem:[#allocation4 + $0x10] sm:$0xff]  ;;  %v728_v11 = vpack.c.bf16 %v300_v9, %v299_v8  ;;  %v302_v12 = vld [vmem:[#allocation4 + $0x18] sm:$0xff] }
  0x51   : > { %v1087_v3 = vshrl.u32 %v291_v0, 7  ;;  %v294_v4 = vand.u32 127, %v291_v0  ;;  %802 = vset.pattern.permute.xlu1 %v922_v5  ;;  %800 = vset.pattern.permute.xlu0 %v923_v6  ;;  %s1195_s22 = smov (!%p277_p7, %s983_s22), 1  ;;  %v290_v13 = vld [vmem:[%s239_s26] sm:$0xff]  ;;  %v731_v15 = vpack.c.bf16 %v302_v12, %v301_v10  ;;  %vm303_vm2 = vcmask 261120   ;;  %s929_s30 = smov 32  }
  0x52   : > { %s701_s23 = sshll.u32 %s1195_s22, 3  ;;  %729 = vmatpush3.bf16.msra.mxu0 %v728_v11  ;;  %v924_v17 = vmov 3   ;;  %v925_v18 = vmov 1   ;;  %v926_v19 = vmov 4   ;;  %v927_v20 = vmov 6   ;;  %s930_s11 = smov 96  }
  0x53   : > { %vm295_vm1 = vcmp.eq.s32.totalorder %v1087_v3, %v294_v4  ;;  %730 = vmatprep.subr.bf16.mxu0 %v919_v1  ;;  %s280_s27 = scalar_lea.vmem %s1172_s0, %s701_s23  ;;  %v928_v21 = vmov 5   ;;  %v706_v22 = vld [vmem:[%s1176_s4] ss:$0 sm:$0xff]  ;;  %s931_s12 = smov 64   ;;  %v932_v29 = vmov 7   ;;  %v475_v44 = vsub.s32 0, %v1087_v3 }
  0x54   : > { %v704_v7 = vsel %vm295_vm1, 1.0, %v921_v2  ;;  %v289_v16 = vld [vmem:[%s280_s27] sm:$0xff]  ;;  %vm413_vm3 = vcmask 523264   ;;  %vm415_vm4 = vcmask 785408   ;;  %s702_s13 = sshll.u32 %s1195_s22, 1  ;;  %vm590_vm5 = vcmp.lt.s32.totalorder %v291_v0, 256 }
  0x55   : > { %v298_v14 = vadd.f32 %v704_v7, %v290_v13  ;;  %s284_s16 = scalar_lea.vmem %s1173_s1, %s702_s13  ;;  %s288_s6 = scalar_lea.vmem %s1177_s5, %s702_s13 }
  0x56   : > { %732 = vmatpush3.bf16.msra.mxu0 %v731_v15  ;;  %v472_v15 = vld [vmem:[%s284_s16] sm:$0x3] }
  0x57   : > { %443 = vperm.xlu1 %802, %v298_v14   ;;  %435 = vperm.xlu0 %800, %v298_v14  }
  0x59   : > { %725 = vmatmul.mubr.msk.f32.vlgmr.msra.gmra.mrb[0].mxu0 %vm303_vm2, %v289_v16 }
  0x5b   : > { %803 = vset.pattern.permute.xlu1 %v924_v17  ;;  %801 = vset.pattern.permute.xlu0 %v925_v18  ;;  %v501_v18 = vrot.slane %v472_v15, %v475_v44 }
  0x5c   : > { %447 = vperm.xlu1 %803, %v298_v14   ;;  %439 = vperm.xlu0 %801, %v298_v14  }
  0x60   : > { %804 = vset.pattern.permute.xlu1 %v926_v19  ;;  %805 = vset.pattern.permute.xlu0 %v928_v21  ;;  %v504_v21 = vsub.s32 1, %v1087_v3 }
  0x61   : > { %451 = vperm.xlu1 %804, %v298_v14  }
  0x65   : > { %806 = vset.pattern.permute.xlu1 %v927_v20 }
  0xd6   : > { %v444_v33 = vpop.permute.xlu1 %443  ;;  %v436_v34 = vpop.permute.xlu0 %435 }
  0xdb   : > { %v448_v35 = vpop.permute.xlu1 %447  ;;  %v440_v36 = vpop.permute.xlu0 %439 }
  0xdc   : > { %v466_v45 = vsel %vm303_vm2, %v436_v34, %v440_v36 }
  0xdd   : > { %v467_v52 = vsel %vm413_vm3, %v466_v45, %v444_v33 }
  0xde   : > { %v468_v59 = vsel %vm415_vm4, %v467_v52, %v448_v35 }
  0xe0   : > { %v452_v37 = vpop.permute.xlu1 %451 }
 0x12c   : > { %v373_v23 = vpop.f32.mrb[0].mxu0 }
 0x12d   : > { %v384_v24 = vadd.f32 %v706_v22, %v373_v23  ;;  %424 = vrot.lane.b32.xlu1 %v373_v23, %s929_s30  ;;  %421 = vrot.lane.b32.xlu0 %v373_v23, %s930_s11  ;;  %v726_v25 = vpop.f32.mrb[1].mxu0  ;;  %v505_v22 = vrot.slane %v472_v15, %v504_v21 }
 0x12f   : > { %v386_v26 = vrot.slane %v384_v24, 1  ;;  %v390_v27 = vrot.slane %v384_v24, 2  ;;  %v394_v28 = vrot.slane %v384_v24, 3  ;;  %v400_v30 = vrot.slane %v384_v24, 5 }
 0x130   : > { %v408_v31 = vrot.slane %v384_v24, 7  ;;  %v404_v32 = vrot.slane %v384_v24, 6  ;;  %v398_v61 = vrot.slane %v384_v24, 4 }
 0x131   : > { %427 = vrot.lane.b32.xlu0 %v373_v23, %s931_s12  ;;  %387 = vrot.lane.b32.xlu1 %v386_v26, %s929_s30 }
 0x135   : > { %391 = vrot.lane.b32.xlu0 %v390_v27, %s931_s12  ;;  %459 = vperm.xlu1 %806, %v298_v14  }
 0x139   : > { %455 = vperm.xlu0 %805, %v298_v14   ;;  %395 = vrot.lane.b32.xlu1 %v394_v28, %s930_s11 }
 0x13a   : > { %807 = vset.pattern.permute.xlu1 %v932_v29 }
 0x13d   : > { %401 = vrot.lane.b32.xlu0 %v400_v30, %s929_s30  ;;  %463 = vperm.xlu1 %807, %v298_v14  }
 0x13e   : > { %808 = vset.pattern.permute.xlu0 %v932_v29 }
 0x141   : > { %409 = vrot.lane.b32.xlu0 %v408_v31, %s930_s11  ;;  %405 = vrot.lane.b32.xlu1 %v404_v32, %s931_s12 }
 0x19f   : > { %v422_v38 = vpop.permute.xlu0 %421  ;;  %v425_v39 = vpop.permute.xlu1 %424 }
 0x1a0   : > { %v430_v46 = vsel %vm303_vm2, %v422_v38, %v373_v23 }
 0x1a1   : > { %v431_v53 = vsel %vm413_vm3, %v430_v46, %v425_v39  ;;  %v933_v46 = vmov 1966171168  }
 0x1a3   : > { %v428_v40 = vpop.permute.xlu0 %427  ;;  %v388_v41 = vpop.permute.xlu1 %387 }
 0x1a4   : > { %v412_v47 = vsel %vm303_vm2, %v384_v24, %v388_v41  ;;  %v432_v55 = vsel %vm415_vm4, %v431_v53, %v428_v40 }
 0x1a7   : > { %v392_v42 = vpop.permute.xlu0 %391 }
 0x1a8   : > { %v414_v48 = vsel %vm413_vm3, %v412_v47, %v392_v42  ;;  %v574_v47 = vunpack.c.l.s4 %v933_v46 }
 0x1b4   : > { %v460_v43 = vpop.permute.xlu1 %459 }
 0x1b8   : > { %v456_v49 = vpop.permute.xlu0 %455  ;;  %v396_v50 = vpop.permute.xlu1 %395 }
 0x1b9   : > { %v416_v51 = vsel %vm415_vm4, %v414_v48, %v396_v50  ;;  %v469_v5 = vsel %vm303_vm2, %v452_v37, %v456_v49  ;;  %v575_v50 = vunpack.c.0.s8 %v574_v47 }
 0x1ba   : > { %v476_v54 = vrot.slane %v416_v51, %v475_v44  ;;  %v470_v8 = vsel %vm413_vm3, %v469_v5, %v460_v43 }
 0x1bc   : > { %v481_v56 = vadd.f32 %v476_v54, %v432_v55  ;;  %v402_v57 = vpop.permute.xlu0 %401  ;;  %v464_v58 = vpop.permute.xlu1 %463 }
 0x1bd   : > { %v417_v63 = vsel %vm303_vm2, %v398_v61, %v402_v57  ;;  %v471_v10 = vsel %vm415_vm4, %v470_v8, %v464_v58  ;;  %v578_v57 = vsub.s32 %v575_v50, %v1087_v3 }
 0x1be   : > { %v483_v60 = vmul.f32 %v481_v56, %v468_v59 }
 0x1c0   : > { %v707_v62 = vmul.f32 -1.442695, %v483_v60  ;;  %v410_v1 = vpop.permute.xlu0 %409  ;;  %v406_v2 = vpop.permute.xlu1 %405 }
 0x1c1   : > { %v418_v4 = vsel %vm413_vm3, %v417_v63, %v406_v2 }
 0x1c2   : > { %809 = vpow2.f32 %v707_v62  ;;  %v419_v6 = vsel %vm415_vm4, %v418_v4, %v410_v1 }
 0x1c3   : > { %v480_v7 = vrot.slane %v419_v6, %v475_v44 }
 0x1c5   : > { %v482_v9 = vadd.f32 %v480_v7, %v432_v55 }
 0x1c7   : > { %v484_v11 = vmul.f32 %v482_v9, %v471_v10 }
 0x1c9   : > { %v708_v12 = vmul.f32 -1.442695, %v484_v11 }
 0x1cb   : > { %811 = vpow2.f32 %v708_v12 }
 0x1cc   : > { %v810_v13 = vpop.eup %809 }
 0x1cd   : > { %v491_v14 = vadd.f32 1.0, %v810_v13 }
 0x1cf   : > { %813 = vrcp.f32 %v491_v14 }
 0x1d5   : > { %v812_v16 = vpop.eup %811 }
 0x1d6   : > { %v492_v17 = vadd.f32 1.0, %v812_v16 }
 0x1d8   : > { %815 = vrcp.f32 %v492_v17 }
 0x1d9   : > { %v814_v19 = vpop.eup %813 }
 0x1da   : > { %v508_v20 = vmul.f32 %v814_v19, %v501_v18 }
 0x1dc   : > { %515 = vrot.lane.b32.xlu0 %v508_v20, %s931_s12  ;;  %511 = vrot.lane.b32.xlu1 %v508_v20, %s930_s11 }
 0x1e0   : > { %519 = vrot.lane.b32.xlu1 %v508_v20, %s929_s30 }
 0x1e2   : > { %v816_v23 = vpop.eup %815 }
 0x1e3   : > { %v509_v24 = vmul.f32 %v816_v23, %v505_v22 }
 0x1e5   : > { %529 = vrot.lane.b32.xlu1 %v509_v24, %s931_s12  ;;  %525 = vrot.lane.b32.xlu0 %v509_v24, %s930_s11 }
 0x1e9   : > { %533 = vrot.lane.b32.xlu0 %v509_v24, %s929_s30 }
 0x24e   : > { %v512_v25 = vpop.permute.xlu1 %511  ;;  %v516_v27 = vpop.permute.xlu0 %515 }
 0x24f   : > { %v514_v26 = vadd.f32 %v512_v25, %v508_v20 }
 0x251   : > { %v518_v28 = vadd.f32 %v516_v27, %v514_v26 }
 0x252   : > { %v520_v29 = vpop.permute.xlu1 %519 }
 0x253   : > { %v522_v30 = vadd.f32 %v520_v29, %v518_v28 }
 0x255   : > { %v523_v31 = vadd.f32 %v522_v30, %v509_v24 }
 0x257   : > { %v526_v32 = vpop.permute.xlu0 %525  ;;  %v530_v34 = vpop.permute.xlu1 %529 }
 0x258   : > { %v528_v33 = vadd.f32 %v526_v32, %v523_v31 }
 0x25a   : > { %v532_v35 = vadd.f32 %v530_v34, %v528_v33 }
 0x25b   : > { %v534_v36 = vpop.permute.xlu0 %533 }
 0x25c   : > { %v536_v37 = vadd.f32 %v534_v36, %v532_v35 }
 0x25e   : > { %v552_v38 = vrot.slane %v536_v37, 5  ;;  %v538_v39 = vrot.slane %v536_v37, 1  ;;  %v556_v40 = vrot.slane %v536_v37, 6  ;;  %v542_v41 = vrot.slane %v536_v37, 2 }
 0x25f   : > { %v560_v42 = vrot.slane %v536_v37, 7  ;;  %v546_v43 = vrot.slane %v536_v37, 3  ;;  %v550_v51 = vrot.slane %v536_v37, 4 }
 0x260   : > { %553 = vrot.lane.b32.xlu0 %v552_v38, %s929_s30  ;;  %539 = vrot.lane.b32.xlu1 %v538_v39, %s929_s30 }
 0x264   : > { %557 = vrot.lane.b32.xlu0 %v556_v40, %s931_s12  ;;  %543 = vrot.lane.b32.xlu1 %v542_v41, %s931_s12 }
 0x268   : > { %561 = vrot.lane.b32.xlu0 %v560_v42, %s930_s11  ;;  %547 = vrot.lane.b32.xlu1 %v546_v43, %s930_s11 }
 0x2d2   : > { %v554_v44 = vpop.permute.xlu0 %553  ;;  %v540_v45 = vpop.permute.xlu1 %539 }
 0x2d3   : > { %v567_v52 = vsel %vm303_vm2, %v550_v51, %v554_v44  ;;  %v564_v53 = vsel %vm303_vm2, %v536_v37, %v540_v45 }
 0x2d6   : > { %v558_v48 = vpop.permute.xlu0 %557  ;;  %v544_v49 = vpop.permute.xlu1 %543 }
 0x2d7   : > { %v568_v54 = vsel %vm413_vm3, %v567_v52, %v558_v48  ;;  %v565_v55 = vsel %vm413_vm3, %v564_v53, %v544_v49 }
 0x2da   : > { %v562_v56 = vpop.permute.xlu0 %561  ;;  %v548_v58 = vpop.permute.xlu1 %547 }
 0x2db   : > { %v569_v59 = vsel %vm415_vm4, %v568_v54, %v562_v56  ;;  %v566_v60 = vsel %vm415_vm4, %v565_v55, %v548_v58 }
 0x2dc   : > { %v572_v61 = vcombine.low %v566_v60, %v569_v59 }
 0x2de   : > { %v579_v62 = vrot.slane %v572_v61, %v578_v57 }
 0x2e0   : > { %v586_v63 = vrot.slane %v579_v62, %v578_v57 }
 0x2e2   : > { %592 = vst.msk [vmem:[%s288_s6] sm:$0x3] %vm590_vm5, %v586_v63 }
 0x2e3 PF: > { %s1189_s7 = smov %s1034_s18  ;;  %p16_p8 = scmp.ge.s32.totalorder %s1008_s28, 4  }
 0x2e4   : > { %s1190_s18 = smov %s905_s19  ;;  %s1191_s19 = smov %s909_s20 }
 0x2e5   : > { %s1192_s20 = smov %s1189_s7  ;;  %s1193_s21 = smov %s1008_s28 }
 0x2e6   :  { %18 = sbr.rel (!%p16_p8) target bundleno = 4 (0x4), region = 90 }
 0x2ed   :  { %612 = vsyncpa [#allocation3], 1 }
 0x2ee   :  { %614 = vsyncpa [#allocation3 + $0x1], 1 }
 0x2ef   :  { %615 = vsyncpa [#allocation5], 1 }

</bundles_post_ra>
